<compile_context>
chip_gen: v7x
topology: tpu7x:2x2x1
jax: 0.10.0
libtpu: 0.0.40
codegen_flags: <defaults>
</compile_context>

<pallas_src>
import math

import jax
import jax.numpy as jnp
import numpy as np
from jax.experimental import pallas as pl
from jax.experimental.pallas import tpu as pltpu


# ----------------------------- kernel body ---------------------------------


def _matmul_bias_kernel(x_ref, w_ref, b_ref, o_ref):
    # x_ref: (TM, K), w_ref: (K, TN), b_ref: (1, TN) [f32], o_ref: (TM, TN)
    acc = jnp.dot(x_ref[...], w_ref[...], preferred_element_type=jnp.float32)
    o_ref[...] = (acc + b_ref[...]).astype(o_ref.dtype)


# --------------------------- tiling heuristics ------------------------------


def _round_up(x, m):
    return ((x + m - 1) // m) * m


def _pick_col_tile(cout):
    """Output-column tile: full extent when small, else a 128-multiple divisor."""
    if cout <= 2048:
        return cout
    for t in (2048, 1024, 512, 256, 128):
        if cout % t == 0:
            return t
    return cout  # full extent fallback


def _pick_row_tile(m, k, tn, itemsize, budget_bytes=8 << 20):
    """Row tile sized so double-buffered x/out tiles stay well under the
    scoped VMEM limit on every generation (incl. v7x's 64 MiB physical)."""
    row_bytes = 2 * (k + tn) * itemsize  # x tile + out tile, double buffered
    tm = budget_bytes // max(row_bytes, 1)
    tm = max(8, min(int(tm), 1024))
    tm = (tm // 8) * 8
    tm = min(tm, _round_up(m, 8))
    return tm


def _pick_pack_factor(cin, cout, itemsize,
                      max_weight_bytes=4 << 20, max_g=512):
    """Pixels-per-row packing factor G so that G*Cout (and ideally G*Cin) is a
    multiple of 128 -> lane-dense, unmasked output stores."""
    if cout % 128 == 0:
        return 1
    g_out = 128 // math.gcd(cout, 128)
    g_in = 128 // math.gcd(cin, 128)
    g_both = (g_out * g_in) // math.gcd(g_out, g_in)
    for g in (g_both, g_out):
        w_bytes = (g * cin) * (g * cout) * itemsize
        if g <= max_g and w_bytes <= max_weight_bytes:
            return g
    return 1


# ------------------------------ pallas wrapper -------------------------------


def conv1x1_pallas(x2d, w2d, b2d_f32, out_dtype):
    """x2d: [M, K], w2d: [K, Cout], b2d_f32: [1, Cout] (f32) -> [M, Cout]."""
    M, K = x2d.shape
    Cout = w2d.shape[1]
    itemsize = jnp.dtype(x2d.dtype).itemsize

    TN = _pick_col_tile(Cout)
    TM = _pick_row_tile(M, K, TN, itemsize)

    M_pad = _round_up(M, TM)
    if M_pad != M:
        x2d = jnp.pad(x2d, ((0, M_pad - M), (0, 0)))

    grid = (M_pad // TM, Cout // TN)

    cost = pl.CostEstimate(
        flops=2 * M_pad * K * Cout,
        transcendentals=0,
        bytes_accessed=(M_pad * K + K * Cout) * itemsize
        + M_pad * Cout * jnp.dtype(out_dtype).itemsize,
    )

    out = pl.pallas_call(
        _matmul_bias_kernel,
        out_shape=jax.ShapeDtypeStruct((M_pad, Cout), out_dtype),
        grid_spec=pltpu.PrefetchScalarGridSpec(
            num_scalar_prefetch=0,
            grid=grid,
            in_specs=[
                pl.BlockSpec((TM, K), lambda i, j: (i, 0)),
                pl.BlockSpec((K, TN), lambda i, j: (0, j)),
                pl.BlockSpec((1, TN), lambda i, j: (0, j)),
            ],
            out_specs=pl.BlockSpec((TM, TN), lambda i, j: (i, j)),
        ),
        compiler_params=pltpu.CompilerParams(
            # No reduction axis: every output tile is written once, both grid
            # axes are independent -> shard across v7x's 2 TCs.
            dimension_semantics=("parallel", "parallel"),
        ),
        cost_estimate=cost,
    )(x2d, w2d, b2d_f32)

    if M_pad != M:
        out = out[:M]
    return out


def upsample_forward(x_nchw, weight, bias, factor=2, compute_dtype=None):
    """Equivalent of UpSample.forward.

    x_nchw: [N, C, H, W]
    weight: [C_out, C_in, 1, 1] with C_out = C * factor * factor
    bias:   [C_out]
    compute_dtype: optional (e.g. jnp.bfloat16 on v6e/v7x) dtype for the x / w
      HBM traffic; accumulation and the bias add stay in f32 inside the kernel.
    returns: [N, C, H*factor, W*factor]  (NCHW, matching PyTorch)
    """
    N, C, H, W = x_nchw.shape
    r = factor
    Cout = C * r * r
    out_dtype = x_nchw.dtype

    # NCHW -> [M, C_in] (channels-last flatten)
    x2d = jnp.transpose(x_nchw, (0, 2, 3, 1)).reshape(N * H * W, C)
    w2d = weight.reshape(Cout, C).T                      # [C_in, C_out]
    b2d = bias.reshape(1, Cout).astype(jnp.float32)      # bias added in f32

    if compute_dtype is not None:
        x2d = x2d.astype(compute_dtype)
        w2d = w2d.astype(compute_dtype)

    M = N * H * W
    itemsize = jnp.dtype(x2d.dtype).itemsize
    G = _pick_pack_factor(C, Cout, itemsize)

    if G > 1:
        # Pack G pixels per row so the kernel's output lane axis is a full
        # multiple of 128 (unmasked stores).  Weight becomes block-diagonal.
        M_pack = -(-M // G)
        pad = M_pack * G - M
        if pad:
            x2d = jnp.pad(x2d, ((0, pad), (0, 0)))
        xp = x2d.reshape(M_pack, G * C)                          # [M/G, G*Cin]
        wp = jnp.kron(jnp.eye(G, dtype=w2d.dtype), w2d)          # [G*Cin, G*Cout]
        bp = jnp.tile(b2d, (1, G))                               # [1, G*Cout] f32
        feat_p = conv1x1_pallas(xp, wp, bp, out_dtype)           # [M/G, G*Cout]
        feat2d = feat_p.reshape(M_pack * G, Cout)[:M]            # [M, Cout]
    else:
        feat2d = conv1x1_pallas(x2d, w2d, b2d, out_dtype)        # [M, Cout]

    # PixelShuffle: out[n, c, h*r+i, w*r+j] = feat[n, c*r*r + i*r + j, h, w]
    # TODO(synk): fold this layout change into the kernel's out_spec to avoid
    # a second full HBM pass over the [M, Cout] tensor.
    feat6 = feat2d.reshape(N, H, W, C, r, r)
    out = jnp.transpose(feat6, (0, 3, 1, 4, 2, 5)).reshape(N, C, H * r, W * r)
    return out


# ------------------------------- init / test --------------------------------


def init_params(key, n_chan, factor=2, dtype=jnp.float32):
    """Deterministic init matching UpSample.__init__ / init_weight."""
    out_chan = n_chan * factor * factor
    k_w, k_b = jax.random.split(key)
    # xavier_normal_ with gain=1: std = sqrt(2 / (fan_in + fan_out))
    fan_in, fan_out = n_chan, out_chan
    std = float(np.sqrt(2.0 / (fan_in + fan_out)))
    weight = std * jax.random.normal(k_w, (out_chan, n_chan, 1, 1), dtype=dtype)
    # PyTorch Conv2d default bias init: U(-1/sqrt(fan_in), 1/sqrt(fan_in))
    bound = 1.0 / float(np.sqrt(fan_in))
    bias = jax.random.uniform(k_b, (out_chan,), dtype=dtype,
                              minval=-bound, maxval=bound)
    return weight, bias


if __name__ == "__main__":
    key = jax.random.PRNGKey(0)
    k_x, k_p = jax.random.split(key)

    N, C, H, W = 2, 4, 16, 16
    factor = 2

    x = jax.random.normal(k_x, (N, C, H, W), dtype=jnp.float32)
    weight, bias = init_params(k_p, C, factor)

    out = upsample_forward(x, weight, bias, factor)
    out = jax.block_until_ready(out)

    # pure-JAX reference of the same math
    ref2d = (jnp.transpose(x, (0, 2, 3, 1)).reshape(N * H * W, C)
             @ weight.reshape(C * factor * factor, C).T
             + bias[None, :])
    ref = jnp.transpose(ref2d.reshape(N, H, W, C, factor, factor),
                        (0, 3, 1, 4, 2, 5)).reshape(N, C, H * factor, W * factor)
    assert out.shape == (N, C, H * factor, W * factor)
    np.testing.assert_allclose(np.asarray(out), np.asarray(ref),
                               rtol=1e-5, atol=1e-5)

    # bf16-I/O variant (bandwidth path recommended for v6e / v7x), f32 accum.
    out_bf16 = upsample_forward(x, weight, bias, factor,
                                compute_dtype=jnp.bfloat16)
    out_bf16 = jax.block_until_ready(out_bf16)
    np.testing.assert_allclose(np.asarray(out_bf16), np.asarray(ref),
                               rtol=2e-2, atol=2e-2)

    print("KERNEL_OK")
</pallas_src>

<mosaic_0001>
module attributes {stable_mosaic.version = 11 : i64} {
  func.func @_matmul_bias_kernel(%arg0: i32, %arg1: i32, %arg2: memref<16x128xf32, #tpu.memory_space<vmem>>, %arg3: memref<128x512xf32, #tpu.memory_space<vmem>>, %arg4: memref<1x512xf32, #tpu.memory_space<vmem>>, %arg5: memref<16x512xf32, #tpu.memory_space<vmem>>) attributes {dimension_semantics = [#tpu.dimension_semantics<parallel>, #tpu.dimension_semantics<parallel>], iteration_bounds = array<i64: 1, 1>, scalar_prefetch = 0 : i64, scratch_operands = 0 : i64, tpu.core_type = #tpu.core_type<tc>, window_params = [{transform_indices = @transform_0, window_bounds = array<i64: 16, 128>}, {transform_indices = @transform_1, window_bounds = array<i64: 128, 512>}, {transform_indices = @transform_2, window_bounds = array<i64: 1, 512>}, {transform_indices = @transform_3, window_bounds = array<i64: 16, 512>}]} {
    %c0 = arith.constant 0 : index
    %c0_0 = arith.constant 0 : index
    %0 = vector.load %arg2[%c0, %c0_0] : memref<16x128xf32, #tpu.memory_space<vmem>>, vector<16x128xf32>
    %c0_1 = arith.constant 0 : index
    %c0_2 = arith.constant 0 : index
    %1 = vector.load %arg3[%c0_1, %c0_2] : memref<128x512xf32, #tpu.memory_space<vmem>>, vector<128x512xf32>
    %cst = arith.constant dense<0.000000e+00> : vector<16x512xf32>
    %2 = tpu.matmul %0, %1, %cst {dimension_numbers = #tpu.dot_dimension_numbers<[1], [0], [0], [1], [0, 0, 1, 1], [], []>} : vector<16x128xf32>, vector<128x512xf32>, vector<16x512xf32> -> vector<16x512xf32>
    %c0_3 = arith.constant 0 : index
    %c0_4 = arith.constant 0 : index
    %3 = vector.load %arg4[%c0_3, %c0_4] : memref<1x512xf32, #tpu.memory_space<vmem>>, vector<1x512xf32>
    %4 = vector.broadcast %3 : vector<1x512xf32> to vector<16x512xf32>
    %5 = arith.addf %2, %4 : vector<16x512xf32>
    %c0_5 = arith.constant 0 : index
    %c0_6 = arith.constant 0 : index
    %6 = vector.load %arg5[%c0_5, %c0_6] : memref<16x512xf32, #tpu.memory_space<vmem>>, vector<16x512xf32>
    tpu.vector_store %arg5[%c0_5, %c0_6], %5 {strides = array<i32>} : memref<16x512xf32, #tpu.memory_space<vmem>>, vector<16x512xf32>,
    return
  }
  func.func @transform_0(%arg0: i32, %arg1: i32) -> (i32, i32) {
    %c0_i32 = arith.constant 0 : i32
    %c0_i32_0 = arith.constant 0 : i32
    return %arg0, %c0_i32 : i32, i32
  }
  func.func @transform_1(%arg0: i32, %arg1: i32) -> (i32, i32) {
    %c0_i32 = arith.constant 0 : i32
    %c0_i32_0 = arith.constant 0 : i32
    return %c0_i32, %arg1 : i32, i32
  }
  func.func @transform_2(%arg0: i32, %arg1: i32) -> (i32, i32) {
    %c0_i32 = arith.constant 0 : i32
    %c0_i32_0 = arith.constant 0 : i32
    return %c0_i32, %arg1 : i32, i32
  }
  func.func @transform_3(%arg0: i32, %arg1: i32) -> (i32, i32) {
    %c0_i32 = arith.constant 0 : i32
    return %arg0, %arg1 : i32, i32
  }
}

</mosaic_0001>

<bundles_post_ra>
// kernel: tpu_custom_call.1
= control target key start
LH: loop header
LB: loop body
LE: loop exit
PB: predicated region body
PF: predicated region fallthrough
CT: control target
= control target key end

     0   :  { %8 = vsyncpa [#allocation3], 0  ;;  %s532_s0 = inlined_call_operand.hbm [shape: f32[16,128], index: 0, kind: input, shape index: {}]   ;;  %s533_s1 = inlined_call_operand.hbm [shape: f32[128,512], index: 1, kind: input, shape index: {}]   ;;  %s534_s2 = inlined_call_operand.vmem [shape: f32[1,512], index: 2, kind: input, shape index: {}]   ;;  %s535_s3 = inlined_call_operand.hbm [shape: f32[16,512], index: 3, kind: output, shape index: {}]  }
   0x1   :  { %9 = vsyncpa [#allocation6], 0 }
   0x2   :  { %10 = vsyncpa [#allocation4], 0  ;;  %s455_s12 = smov [#allocation2]   ;;  %s383_s16 = scalar_lea.hbm %s532_s0, 256 }
   0x3   :  { %s16_s13 = sshll.u32 %s455_s12, 4  ;;  %p384_p0 = scmp.ne.s32.totalorder %s532_s0, %s383_s16  ;;  %s17_s13 = int_to_ptr.vmem [resolvable:$true] %s16_s13 }
   0x4   :  { %p387_p1 = scmp.lt.u32.totalorder %s383_s16, %s532_s0 }
   0x6   :  { %p389_p2 = pnand %p387_p1, %p384_p0 }
   0x8   :  { %392 = shalt.err (!%p389_p2)
}
   0x9   :  { %s393_s21 = scalar_lea.vmem %s17_s13, 256  ;;  %p398_p4 = scmp.lt.s32.totalorder %s17_s13, %s17_s13 }
   0xa   :  { %p394_p3 = scmp.ne.s32.totalorder %s17_s13, %s393_s21  ;;  %p399_p5 = scmp.lt.s32.totalorder %s393_s21, %s393_s21 }
   0xc   :  { %p400_p6 = por %p399_p5, %p398_p4 }
   0xe   :  { %p401_p7 = pnand %p400_p6, %p394_p3 }
  0x10   :  { %404 = shalt.err (!%p401_p7)
}
  0x11   :  { %s456_s22 = smov 128   ;;  %s457_s23 = smov 8  }
  0x12   :  { %22 = dma.hbm_to_vmem [thread:$0]  %s532_s0, 256, %s17_s13, [#allocation3], %s456_s22, %s456_s22, %s457_s23  }
  0x13   :  { %s458_s26 = smov [#allocation5]   ;;  %s405_s30 = scalar_lea.hbm %s533_s1, 8192 }
  0x14   :  { %s28_s27 = sshll.u32 %s458_s26, 4  ;;  %p406_p8 = scmp.ne.s32.totalorder %s533_s1, %s405_s30  ;;  %s29_s27 = int_to_ptr.vmem [resolvable:$true] %s28_s27 }
  0x15   :  { %p409_p9 = scmp.lt.u32.totalorder %s405_s30, %s533_s1 }
  0x17   :  { %p411_p10 = pnand %p409_p9, %p406_p8 }
  0x19   :  { %414 = shalt.err (!%p411_p10)
}
  0x1a   :  { %s415_s8 = scalar_lea.vmem %s29_s27, 8192  ;;  %p420_p12 = scmp.lt.s32.totalorder %s29_s27, %s29_s27 }
  0x1b   :  { %p416_p11 = scmp.ne.s32.totalorder %s29_s27, %s415_s8  ;;  %p421_p13 = scmp.lt.s32.totalorder %s415_s8, %s415_s8 }
  0x1d   :  { %p422_p0 = por %p421_p13, %p420_p12 }
  0x1f   :  { %p423_p1 = pnand %p422_p0, %p416_p11 }
  0x21   :  { %426 = shalt.err (!%p423_p1)
}
  0x22   :  { %s459_s0 = smov 512   ;;  %s460_s9 = smov 32  }
  0x23   :  { %34 = dma.hbm_to_vmem [thread:$0]  %s533_s1, 8192, %s29_s27, [#allocation6], %s459_s0, %s459_s0, %s460_s9  }
  0x24   :  { %449 = dma.done.wait [#allocation3], 256  }
  0x25   :  { %450 = vsyncadd [#allocation3], 4294967040 }
  0x26   :  { %451 = dma.done.wait [#allocation6], 8192  }
  0x27   :  { %452 = vsyncadd [#allocation6], 4294959104  ;;  %v461_v0 = vmov 0.0   ;;  %v46_v1 = vld [vmem:[#allocation5 + $0x8] sm:$0xff]  ;;  %v48_v3 = vld [vmem:[#allocation5 + $0x18] sm:$0xff] }
  0x28   :  { %195 = vmatprep.mubr.f32.mxu0 %v461_v0  ;;  %272 = vmatprep.mubr.f32.mxu1 %v461_v0  ;;  %v50_v2 = vld [vmem:[#allocation5 + $0x28] sm:$0xff]  ;;  %v52_v5 = vld [vmem:[#allocation5 + $0x38] sm:$0xff]  ;;  %v45_v6 = vld [vmem:[#allocation5] sm:$0xff] }
  0x29   :  { %v311_v4 = vpack.c.bf16 %v50_v2, %v46_v1  ;;  %v49_v7 = vld [vmem:[#allocation5 + $0x20] sm:$0xff]  ;;  %v343_v8 = vpack.c.bf16 %v52_v5, %v48_v3  ;;  %v47_v10 = vld [vmem:[#allocation5 + $0x10] sm:$0xff]  ;;  %v54_v12 = vld [vmem:[#allocation5 + $0x48] sm:$0xff] }
  0x2a   :  { %v313_v9 = vpack.c.bf16 %v49_v7, %v45_v6  ;;  %v51_v11 = vld [vmem:[#allocation5 + $0x30] sm:$0xff]  ;;  %v58_v14 = vld [vmem:[#allocation5 + $0x68] sm:$0xff]  ;;  %v56_v15 = vld [vmem:[#allocation5 + $0x58] sm:$0xff] }
  0x2b   :  { %312 = vmatprep.subr.bf16.mxu0 %v311_v4  ;;  %v345_v13 = vpack.c.bf16 %v51_v11, %v47_v10  ;;  %v60_v16 = vld [vmem:[#allocation5 + $0x78] sm:$0xff]  ;;  %344 = vmatprep.subr.bf16.mxu1 %v343_v8  ;;  %v315_v17 = vpack.c.bf16 %v58_v14, %v54_v12  ;;  %v53_v19 = vld [vmem:[#allocation5 + $0x40] sm:$0xff]  ;;  %v55_v21 = vld [vmem:[#allocation5 + $0x50] sm:$0xff] }
  0x2c   :  { %314 = vmatpush1.bf16.msra.mxu0 %v313_v9  ;;  %v347_v18 = vpack.c.bf16 %v60_v16, %v56_v15  ;;  %v57_v20 = vld [vmem:[#allocation5 + $0x60] sm:$0xff]  ;;  %v59_v23 = vld [vmem:[#allocation5 + $0x70] sm:$0xff]  ;;  %v62_v24 = vld [vmem:[#allocation5 + $0x88] sm:$0xff] }
  0x2d   :  { %346 = vmatpush1.bf16.msra.mxu1 %v345_v13  ;;  %v317_v22 = vpack.c.bf16 %v57_v20, %v53_v19  ;;  %v66_v25 = vld [vmem:[#allocation5 + $0xa8] sm:$0xff]  ;;  %316 = vmatprep.subr.bf16.mxu0 %v315_v17  ;;  %v349_v26 = vpack.c.bf16 %v59_v23, %v55_v21  ;;  %v64_v28 = vld [vmem:[#allocation5 + $0x98] sm:$0xff]  ;;  %v61_v30 = vld [vmem:[#allocation5 + $0x80] sm:$0xff] }
  0x2e   :  { %348 = vmatprep.subr.bf16.mxu1 %v347_v18  ;;  %v319_v27 = vpack.c.bf16 %v66_v25, %v62_v24  ;;  %v68_v29 = vld [vmem:[#allocation5 + $0xb8] sm:$0xff]  ;;  %v65_v32 = vld [vmem:[#allocation5 + $0xa0] sm:$0xff]  ;;  %v63_v33 = vld [vmem:[#allocation5 + $0x90] sm:$0xff] }
  0x2f   :  { %v351_v31 = vpack.c.bf16 %v68_v29, %v64_v28  ;;  %v67_v34 = vld [vmem:[#allocation5 + $0xb0] sm:$0xff]  ;;  %v321_v35 = vpack.c.bf16 %v65_v32, %v61_v30  ;;  %v70_v36 = vld [vmem:[#allocation5 + $0xc8] sm:$0xff]  ;;  %v72_v38 = vld [vmem:[#allocation5 + $0xd8] sm:$0xff] }
  0x30   :  { %318 = vmatpush1.bf16.msra.mxu0 %v317_v22  ;;  %v74_v37 = vld [vmem:[#allocation5 + $0xe8] sm:$0xff]  ;;  %v353_v39 = vpack.c.bf16 %v67_v34, %v63_v33  ;;  %v76_v41 = vld [vmem:[#allocation5 + $0xf8] sm:$0xff]  ;;  %v69_v42 = vld [vmem:[#allocation5 + $0xc0] sm:$0xff] }
  0x31   :  { %350 = vmatpush1.bf16.msra.mxu1 %v349_v26  ;;  %320 = vmatprep.subr.bf16.mxu0 %v319_v27  ;;  %v323_v40 = vpack.c.bf16 %v74_v37, %v70_v36  ;;  %v73_v43 = vld [vmem:[#allocation5 + $0xe0] sm:$0xff]  ;;  %v355_v44 = vpack.c.bf16 %v76_v41, %v72_v38  ;;  %v71_v45 = vld [vmem:[#allocation5 + $0xd0] sm:$0xff]  ;;  %v78_v47 = vld [vmem:[#allocation5 + $0x108] sm:$0xff]  ;;  %v111_v36 = vlaneseq }
  0x32   :  { %352 = vmatprep.subr.bf16.mxu1 %v351_v31  ;;  %v75_v46 = vld [vmem:[#allocation5 + $0xf0] sm:$0xff]  ;;  %v82_v48 = vld [vmem:[#allocation5 + $0x128] sm:$0xff]  ;;  %v80_v49 = vld [vmem:[#allocation5 + $0x118] sm:$0xff]  ;;  %v325_v51 = vpack.c.bf16 %v73_v43, %v69_v42 }
  0x33   :  { %v84_v50 = vld [vmem:[#allocation5 + $0x138] sm:$0xff]  ;;  %v357_v52 = vpack.c.bf16 %v75_v46, %v71_v45  ;;  %v327_v53 = vpack.c.bf16 %v82_v48, %v78_v47  ;;  %v77_v54 = vld [vmem:[#allocation5 + $0x100] sm:$0xff]  ;;  %v79_v56 = vld [vmem:[#allocation5 + $0x110] sm:$0xff]  ;;  %v112_v37 = vshrl.u32 %v111_v36, 7 }
  0x34   :  { %322 = vmatpush1.bf16.msra.mxu0 %v321_v35  ;;  %v81_v55 = vld [vmem:[#allocation5 + $0x120] sm:$0xff]  ;;  %v359_v57 = vpack.c.bf16 %v84_v50, %v80_v49  ;;  %v83_v58 = vld [vmem:[#allocation5 + $0x130] sm:$0xff]  ;;  %v86_v59 = vld [vmem:[#allocation5 + $0x148] sm:$0xff] }
  0x35   :  { %354 = vmatpush1.bf16.msra.mxu1 %v353_v39  ;;  %324 = vmatprep.subr.bf16.mxu0 %v323_v40  ;;  %v90_v60 = vld [vmem:[#allocation5 + $0x168] sm:$0xff]  ;;  %v88_v61 = vld [vmem:[#allocation5 + $0x158] sm:$0xff]  ;;  %v329_v63 = vpack.c.bf16 %v81_v55, %v77_v54  ;;  %v361_v1 = vpack.c.bf16 %v83_v58, %v79_v56  ;;  %v85_v3 = vld [vmem:[#allocation5 + $0x140] sm:$0xff]  ;;  %v113_v38 = vsub.s32 0, %v112_v37  ;;  %v121_v40 = vsub.s32 2, %v112_v37 }
  0x36   :  { %356 = vmatprep.subr.bf16.mxu1 %v355_v44  ;;  %v92_v62 = vld [vmem:[#allocation5 + $0x178] sm:$0xff]  ;;  %v331_v2 = vpack.c.bf16 %v90_v60, %v86_v59  ;;  %v89_v4 = vld [vmem:[#allocation5 + $0x160] sm:$0xff]  ;;  %v87_v5 = vld [vmem:[#allocation5 + $0x150] sm:$0xff]  ;;  %v117_v41 = vsub.s32 1, %v112_v37  ;;  %v125_v42 = vsub.s32 3, %v112_v37 }
  0x37   :  { %v363_v6 = vpack.c.bf16 %v92_v62, %v88_v61  ;;  %v91_v7 = vld [vmem:[#allocation5 + $0x170] sm:$0xff]  ;;  %v94_v8 = vld [vmem:[#allocation5 + $0x188] sm:$0xff]  ;;  %v96_v10 = vld [vmem:[#allocation5 + $0x198] sm:$0xff]  ;;  %v333_v12 = vpack.c.bf16 %v89_v4, %v85_v3 }
  0x38   :  { %326 = vmatpush1.bf16.msra.mxu0 %v325_v51  ;;  %v98_v9 = vld [vmem:[#allocation5 + $0x1a8] sm:$0xff]  ;;  %v100_v11 = vld [vmem:[#allocation5 + $0x1b8] sm:$0xff]  ;;  %v365_v13 = vpack.c.bf16 %v91_v7, %v87_v5  ;;  %v93_v15 = vld [vmem:[#allocation5 + $0x180] sm:$0xff] }
  0x39   :  { %358 = vmatpush1.bf16.msra.mxu1 %v357_v52  ;;  %328 = vmatprep.subr.bf16.mxu0 %v327_v53  ;;  %v335_v14 = vpack.c.bf16 %v98_v9, %v94_v8  ;;  %v97_v16 = vld [vmem:[#allocation5 + $0x1a0] sm:$0xff]  ;;  %v95_v17 = vld [vmem:[#allocation5 + $0x190] sm:$0xff]  ;;  %v367_v18 = vpack.c.bf16 %v100_v11, %v96_v10  ;;  %v102_v20 = vld [vmem:[#allocation5 + $0x1c8] sm:$0xff] }
  0x3a   :  { %360 = vmatprep.subr.bf16.mxu1 %v359_v57  ;;  %v99_v19 = vld [vmem:[#allocation5 + $0x1b0] sm:$0xff]  ;;  %v106_v21 = vld [vmem:[#allocation5 + $0x1e8] sm:$0xff]  ;;  %v104_v22 = vld [vmem:[#allocation5 + $0x1d8] sm:$0xff]  ;;  %v337_v24 = vpack.c.bf16 %v97_v16, %v93_v15 }
  0x3b   :  { %v108_v23 = vld [vmem:[#allocation5 + $0x1f8] sm:$0xff]  ;;  %v369_v25 = vpack.c.bf16 %v99_v19, %v95_v17  ;;  %v339_v26 = vpack.c.bf16 %v106_v21, %v102_v20  ;;  %v101_v27 = vld [vmem:[#allocation5 + $0x1c0] sm:$0xff]  ;;  %v103_v30 = vld [vmem:[#allocation5 + $0x1d0] sm:$0xff] }
  0x3c   :  { %330 = vmatpush1.bf16.msra.mxu0 %v329_v63  ;;  %v105_v28 = vld [vmem:[#allocation5 + $0x1e0] sm:$0xff]  ;;  %v371_v29 = vpack.c.bf16 %v108_v23, %v104_v22  ;;  %v107_v31 = vld [vmem:[#allocation5 + $0x1f0] sm:$0xff]  ;;  %v44_v35 = vld [vmem:[#allocation2 + $0x8] sm:$0xff] }
  0x3d   :  { %362 = vmatpush1.bf16.msra.mxu1 %v361_v1  ;;  %332 = vmatprep.subr.bf16.mxu0 %v331_v2  ;;  %v341_v32 = vpack.c.bf16 %v105_v28, %v101_v27  ;;  %v373_v33 = vpack.c.bf16 %v107_v31, %v103_v30  ;;  %v43_v34 = vld [vmem:[#allocation2] sm:$0xff] }
  0x3e   :  { %364 = vmatprep.subr.bf16.mxu1 %v363_v6  ;;  %v109_v39 = vld [vmem:[%s534_s2] sm:$0xf]  ;;  %s462_s2 = smov [#allocation7]  }
  0x3f   :  { %v114_v43 = vrot.slane %v109_v39, %v113_v38  ;;  %v122_v44 = vrot.slane %v109_v39, %v121_v40  ;;  %v118_v45 = vrot.slane %v109_v39, %v117_v41  ;;  %v126_v46 = vrot.slane %v109_v39, %v125_v42  ;;  %s298_s13 = sshll.u32 %s462_s2, 4  ;;  %s299_s13 = int_to_ptr.vmem [resolvable:$true] %s298_s13 }
  0x40   :  { %334 = vmatpush1.bf16.msra.mxu0 %v333_v12  ;;  %s427_s14 = scalar_lea.vmem %s299_s13, 1024  ;;  %p432_p3 = scmp.lt.s32.totalorder %s299_s13, %s299_s13 }
  0x41   :  { %366 = vmatpush1.bf16.msra.mxu1 %v365_v13  ;;  %336 = vmatprep.subr.bf16.mxu0 %v335_v14  ;;  %p428_p2 = scmp.ne.s32.totalorder %s299_s13, %s427_s14  ;;  %p433_p4 = scmp.lt.s32.totalorder %s427_s14, %s427_s14 }
  0x42   :  { %368 = vmatprep.subr.bf16.mxu1 %v367_v18 }
  0x43   :  { %p434_p5 = por %p433_p4, %p432_p3 }
  0x44   :  { %338 = vmatpush1.bf16.msra.mxu0 %v337_v24 }
  0x45   :  { %370 = vmatpush1.bf16.msra.mxu1 %v369_v25  ;;  %340 = vmatprep.subr.bf16.mxu0 %v339_v26  ;;  %p435_p6 = pnand %p434_p5, %p428_p2 }
  0x46   :  { %372 = vmatprep.subr.bf16.mxu1 %v371_v29 }
  0x48   :  { %342 = vmatpush1.bf16.msra.mxu0 %v341_v32 }
  0x49   :  { %374 = vmatpush1.bf16.msra.mxu1 %v373_v33 }
  0x4b   :  { %196 = vmatmul.mubr.f32.vlgmr.msra.gmra.mrb[0].mxu0 %v43_v34 }
  0x4c   :  { %273 = vmatmul.mubr.f32.vlgmr.msra.gmra.mrb[0].mxu1 %v43_v34  ;;  %201 = vmatprep.mubr.f32.mxu0 %v461_v0 }
  0x4d   :  { %278 = vmatprep.mubr.f32.mxu1 %v461_v0 }
  0x4f   :  { %202 = vmatmul.mubr.f32.gmra.mrb[2].mxu0 %v44_v35 }
  0x50   :  { %279 = vmatmul.mubr.f32.gmra.mrb[2].mxu1 %v44_v35 }
 0x11e   :  { %v197_v47 = vpop.f32.mrb[0].mxu0 }
 0x11f   :  { %v198_v48 = vadd.f32 %v197_v47, %v114_v43  ;;  %v274_v49 = vpop.f32.mrb[0].mxu1  ;;  %v199_v0 = vpop.f32.mrb[1].mxu0 }
 0x120   :  { %v275_v50 = vadd.f32 %v274_v49, %v122_v44  ;;  %v200_v51 = vadd.f32 %v199_v0, %v118_v45  ;;  %v276_v52 = vpop.f32.mrb[1].mxu1 }
 0x121   :  { %285 = vst [vmem:[#allocation7] sm:$0xff] %v198_v48  ;;  %v277_v53 = vadd.f32 %v276_v52, %v126_v46 }
 0x122   :  { %287 = vst [vmem:[#allocation7 + $0x10] sm:$0xff] %v275_v50  ;;  %286 = vst [vmem:[#allocation7 + $0x8] sm:$0xff] %v200_v51  ;;  %v203_v54 = vpop.f32.mrb[2].mxu0 }
 0x123   :  { %288 = vst [vmem:[#allocation7 + $0x18] sm:$0xff] %v277_v53  ;;  %v204_v55 = vadd.f32 %v203_v54, %v114_v43  ;;  %v280_v56 = vpop.f32.mrb[2].mxu1  ;;  %v205_v57 = vpop.f32.mrb[3].mxu0 }
 0x124   :  { %v281_v58 = vadd.f32 %v280_v56, %v122_v44  ;;  %v206_v59 = vadd.f32 %v205_v57, %v118_v45  ;;  %v282_v60 = vpop.f32.mrb[3].mxu1 }
 0x125   :  { %289 = vst [vmem:[#allocation7 + $0x20] sm:$0xff] %v204_v55  ;;  %v283_v61 = vadd.f32 %v282_v60, %v126_v46 }
 0x126   :  { %291 = vst [vmem:[#allocation7 + $0x30] sm:$0xff] %v281_v58  ;;  %290 = vst [vmem:[#allocation7 + $0x28] sm:$0xff] %v206_v59 }
 0x127   :  { %292 = vst [vmem:[#allocation7 + $0x38] sm:$0xff] %v283_v61 }
 0x128   :  { %438 = shalt.err (!%p435_p6)
}
 0x129   :  { %s439_s17 = scalar_lea.hbm %s535_s3, 1024 }
 0x12a   :  { %p440_p7 = scmp.ne.s32.totalorder %s535_s3, %s439_s17  ;;  %p443_p8 = scmp.lt.u32.totalorder %s439_s17, %s535_s3 }
 0x12c   :  { %p445_p9 = pnand %p443_p8, %p440_p7 }
 0x12e   :  { %448 = shalt.err (!%p445_p9)
}
 0x12f   :  { %304 = dma.vmem_to_hbm [thread:$0]  %s299_s13, 1024, %s535_s3, [#allocation4], %s459_s0, %s459_s0, %s460_s9  }
 0x130   :  { %453 = dma.done.wait [#allocation4], 1024  }
 0x131   :  { %454 = vsyncadd [#allocation4], 4294966272 }
 0x132   :  { %308 = vsyncpa [#allocation3], 1 }
 0x133   :  { %309 = vsyncpa [#allocation6], 1 }
 0x134   :  { %310 = vsyncpa [#allocation4], 1 }

</bundles_post_ra>
